<compile_context>
chip_gen: v5e
topology: v5e:2x2
jax: 0.10.0
libtpu: 0.0.40
codegen_flags: <defaults>
</compile_context>

<pallas_src>
import math
from functools import partial

import numpy as np
import jax
import jax.numpy as jnp
from jax.experimental import pallas as pl
from jax.experimental.pallas import tpu as pltpu


# ---------------------------------------------------------------------------
# Kernels
# ---------------------------------------------------------------------------

def _interaction_kernel(x_ref, y_ref, a_ref, b_ref, u1_ref, u2_ref, s_ref, out_ref):
    """General O >= 1 path: 3 MXU matmuls + one VPU multiply, no concatenates."""
    # Cast activations to the weight dtype (no-op unless a bf16 MXU was requested).
    z1 = jnp.dot(x_ref[...].astype(a_ref.dtype), a_ref[...],
                 preferred_element_type=jnp.float32) + u1_ref[...]
    z2 = jnp.dot(y_ref[...].astype(b_ref.dtype), b_ref[...],
                 preferred_element_type=jnp.float32) + u2_ref[...]
    p = z1 * z2              # covers bilinear products, both linear terms and the bias
    # Segment-sum selector stays f32: p is already f32-accumulated.
    out_ref[...] = jnp.dot(p, s_ref[...],
                           preferred_element_type=jnp.float32).astype(out_ref.dtype)


def _interaction_o1_kernel(x_ref, y_ref, wbd_ref, wyrow_ref, wxcol_ref, bias_ref,
                           out_ref):
    """Specialised O == 1 path: one big MXU matmul + VPU multiply + XLU row-sum.

    For O == 1 the y-side 0/1 selector is the identity, so the bilinear slab of
    z2 is just y; the segment-sum matmul degenerates to a row reduction.  lin_y
    is folded into the same reduction by adding Wy (as a row) to z before the
    multiply; lin_x is a tiny N=1 matmul.
    """
    z = jnp.dot(x_ref[...].astype(wbd_ref.dtype), wbd_ref[...],
                preferred_element_type=jnp.float32) + wyrow_ref[...]
    bil = jnp.sum(z * y_ref[...].astype(jnp.float32), axis=-1, keepdims=True)
    lin_x = jnp.dot(x_ref[...].astype(jnp.float32), wxcol_ref[...],
                    preferred_element_type=jnp.float32)
    out_ref[...] = (bil + lin_x + bias_ref[...]).astype(out_ref.dtype)


# ---------------------------------------------------------------------------
# Wrapper helpers
# ---------------------------------------------------------------------------

def _round_up(v, m):
    return ((v + m - 1) // m) * m


def _block_diag(blocks):
    """Block-diagonal builder (wrapper-side glue; traced once under jit)."""
    rows = sum(b.shape[0] for b in blocks)
    cols = sum(b.shape[1] for b in blocks)
    out = jnp.zeros((rows, cols), blocks[0].dtype)
    r = c = 0
    for b in blocks:
        out = out.at[r:r + b.shape[0], c:c + b.shape[1]].set(b)
        r += b.shape[0]
        c += b.shape[1]
    return out


def _vmem_budget_and_limit():
    """Per-chip VMEM tile budget + explicit scoped-VMEM limit (v7x: 64 MiB part)."""
    mib = 1024 * 1024
    try:
        cap = int(pltpu.get_tpu_info().vmem_capacity_bytes)
    except Exception:
        cap = 64 * mib                       # conservative (v7x-sized) fallback
    budget = min(cap // 3, 40 * mib)         # what our resident tiles may occupy
    limit = max(32 * mib, min((cap * 3) // 4, 96 * mib))
    return budget, limit


def _pick_block_b(B, requested, per_row_bytes, fixed_bytes, budget_bytes):
    """Batch tile: multiple of 8, >= 2 grid steps when possible, fits VMEM budget."""
    if B <= 8:
        return B                                       # single full block (legal)
    if requested is not None:
        blk = max(8, (min(requested, B) // 8) * 8)     # round user value to x8
        return B if blk >= B else blk
    blk = min(1024, _round_up(pl.cdiv(B, 2), 8))       # >=2 steps -> both v7x TCs
    while blk > 8 and fixed_bytes + blk * per_row_bytes > budget_bytes:
        blk = max(8, ((blk // 2) // 8) * 8)
    return B if blk >= B else blk


def _invariant_spec(block_shape):
    """Grid-invariant operand: constant index_map + a single VMEM buffer."""
    idx = lambda i: (0,) * len(block_shape)
    try:
        return pl.BlockSpec(block_shape, idx, pipeline_mode=pl.Buffered(1))
    except Exception:                                  # older JAX: default 2-buf
        return pl.BlockSpec(block_shape, idx)


# ---------------------------------------------------------------------------
# Public entry point
# ---------------------------------------------------------------------------

@partial(jax.jit, static_argnames=("num_heads", "output_dim", "block_b", "mxu_dtype"))
def interaction_aggregation(x, y, params, *, num_heads, output_dim,
                            block_b=None, mxu_dtype=None):
    """InteractionAggregation forward.

    params: PyTorch-layout tensors: w_x_weight (O, x_dim), w_x_bias (O,),
    w_y_weight (O, y_dim), w_y_bias (O,), w_xy (H*hx*hy, O).
    The fused weight/selector matrices are built inside the jitted wrapper, so
    they are part of the compiled graph (not per-step host glue).  Output dtype
    is x.dtype (f32 accumulation, rounded on the final store).
    """
    B, x_dim = x.shape
    By, y_dim = y.shape
    assert B == By, "x and y must share the batch dimension"
    H, O = num_heads, output_dim
    assert x_dim % H == 0 and y_dim % H == 0, "Input dim must be divisible by num_heads!"
    hx, hy = x_dim // H, y_dim // H

    f32 = jnp.float32
    out_dtype = x.dtype
    w_dtype = np.dtype(mxu_dtype) if mxu_dtype is not None else np.dtype(x.dtype)
    in_itm = np.dtype(x.dtype).itemsize
    w_itm = w_dtype.itemsize
    out_itm = np.dtype(out_dtype).itemsize

    budget, vmem_limit = _vmem_budget_and_limit()

    # PyTorch's forward reinterprets the flat (H*hx*hy, O) buffer via
    # .view(H, hx, -1): last-axis index m = j*O + o; the later .view(-1, H, O, hy)
    # then reads m as (o, j).  Building everything from the same row-major
    # reshape reproduces that exactly (the `reference` below does the same).
    w4 = params["w_xy"].astype(f32).reshape(H, hx, O * hy)
    wx_t = params["w_x_weight"].T.astype(f32)                      # (x_dim, O)
    wy_t = params["w_y_weight"].T.astype(f32)                      # (y_dim, O)
    bias = (params["w_x_bias"] + params["w_y_bias"]).astype(f32)   # (O,)

    if O == 1:
        # ---------------- specialised O == 1 fast path ----------------
        wbd = _block_diag([w4[h] for h in range(H)]).astype(w_dtype)   # (x_dim, y_dim)
        wy_row = wy_t.reshape(1, y_dim)                                # f32
        wx_col = wx_t.reshape(x_dim, 1)                                # f32
        bias11 = bias.reshape(1, 1)                                    # f32

        per_row = 2 * (x_dim + y_dim) * in_itm + 2 * out_itm + 2 * y_dim * 4
        fixed = x_dim * y_dim * w_itm + (x_dim + y_dim + 1) * 4
        blk = _pick_block_b(B, block_b, per_row, fixed, budget)
        grid = (pl.cdiv(B, blk),)

        flops = 2 * B * x_dim * y_dim + 2 * B * (x_dim + y_dim)
        bytes_acc = (B * (x_dim * in_itm + y_dim * in_itm + out_itm)
                     + x_dim * y_dim * w_itm + (x_dim + y_dim + 1) * 4)

        return pl.pallas_call(
            _interaction_o1_kernel,
            out_shape=jax.ShapeDtypeStruct((B, 1), out_dtype),
            grid_spec=pltpu.PrefetchScalarGridSpec(
                num_scalar_prefetch=0,
                grid=grid,
                in_specs=[
                    pl.BlockSpec((blk, x_dim), lambda i: (i, 0)),
                    pl.BlockSpec((blk, y_dim), lambda i: (i, 0)),
                    _invariant_spec((x_dim, y_dim)),
                    _invariant_spec((1, y_dim)),
                    _invariant_spec((x_dim, 1)),
                    _invariant_spec((1, 1)),
                ],
                out_specs=pl.BlockSpec((blk, 1), lambda i: (i, 0)),
            ),
            compiler_params=pltpu.CompilerParams(
                dimension_semantics=("parallel",),
                vmem_limit_bytes=vmem_limit),
            cost_estimate=pl.CostEstimate(flops=flops, transcendentals=0,
                                          bytes_accessed=bytes_acc),
        )(x, y, wbd, wy_row, wx_col, bias11)

    # ------------------------- general O > 1 path -------------------------
    K2 = H * O * hy                        # bilinear-product slab width
    N1 = K2 + 3 * O                        # + lin_x + lin_y + bias column groups
    N1p = _round_up(max(N1, 128), 128)     # lane-dense interior width (review)
    pad = N1p - N1

    # x-side fused weight:  [ blockdiag(W_h) | Wx^T | 0 | 0 | 0pad ]
    w_bd = _block_diag([w4[h] for h in range(H)])                  # (x_dim, K2)
    zx = jnp.zeros((x_dim, O), f32)
    a_mat = jnp.pad(jnp.concatenate([w_bd, wx_t, zx, zx], axis=1),
                    ((0, 0), (0, pad))).astype(w_dtype)            # (x_dim, N1p)

    # y-side fused weight:  [ head-tiling 0/1 selector | 0 | Wy^T | 0 | 0pad ]
    t_head = jnp.tile(jnp.eye(hy, dtype=f32), (1, O))              # (hy, O*hy)
    t_mat = _block_diag([t_head] * H)                              # (y_dim, K2)
    zy = jnp.zeros((y_dim, O), f32)
    b_mat = jnp.pad(jnp.concatenate([t_mat, zy, wy_t, zy], axis=1),
                    ((0, 0), (0, pad))).astype(w_dtype)            # (y_dim, N1p)

    # Additive constants folded into z1 / z2 so (z1 + u1) * (z2 + u2) covers
    # bilinear + lin_x + lin_y + bias with a single VPU multiply.
    u1 = jnp.concatenate([jnp.zeros((K2 + O,), f32), jnp.ones((O,), f32),
                          bias, jnp.zeros((pad,), f32)]).reshape(1, N1p)
    u2 = jnp.concatenate([jnp.zeros((K2,), f32), jnp.ones((O,), f32),
                          jnp.zeros((O,), f32), jnp.ones((O,), f32),
                          jnp.zeros((pad,), f32)]).reshape(1, N1p)

    # Segment-sum selector (stays f32; padded rows are zero so padding is inert).
    s_blk = jnp.repeat(jnp.eye(O, dtype=f32), hy, axis=0)          # (O*hy, O)
    s_bil = jnp.tile(s_blk, (H, 1))                                # (K2, O)
    eye_o = jnp.eye(O, dtype=f32)
    s_mat = jnp.pad(jnp.concatenate([s_bil, eye_o, eye_o, eye_o], axis=0),
                    ((0, pad), (0, 0)))                            # (N1p, O)

    per_row = 2 * (x_dim + y_dim) * in_itm + 2 * O * out_itm + 3 * N1p * 4
    fixed = (x_dim + y_dim) * N1p * w_itm + (2 + O) * N1p * 4
    blk = _pick_block_b(B, block_b, per_row, fixed, budget)
    grid = (pl.cdiv(B, blk),)

    flops = 2 * B * (x_dim + y_dim + O) * N1p
    bytes_acc = (B * ((x_dim + y_dim) * in_itm + O * out_itm)
                 + (x_dim + y_dim) * N1p * w_itm + (2 + O) * N1p * 4)

    return pl.pallas_call(
        _interaction_kernel,
        out_shape=jax.ShapeDtypeStruct((B, O), out_dtype),
        grid_spec=pltpu.PrefetchScalarGridSpec(
            num_scalar_prefetch=0,
            grid=grid,
            in_specs=[
                pl.BlockSpec((blk, x_dim), lambda i: (i, 0)),
                pl.BlockSpec((blk, y_dim), lambda i: (i, 0)),
                _invariant_spec((x_dim, N1p)),
                _invariant_spec((y_dim, N1p)),
                _invariant_spec((1, N1p)),
                _invariant_spec((1, N1p)),
                _invariant_spec((N1p, O)),
            ],
            out_specs=pl.BlockSpec((blk, O), lambda i: (i, 0)),
        ),
        compiler_params=pltpu.CompilerParams(
            dimension_semantics=("parallel",),
            vmem_limit_bytes=vmem_limit),
        cost_estimate=pl.CostEstimate(flops=flops, transcendentals=0,
                                      bytes_accessed=bytes_acc),
    )(x, y, a_mat, b_mat, u1, u2, s_mat)


# ---------------------------------------------------------------------------
# Reference + test
# ---------------------------------------------------------------------------

def reference(x, y, params, num_heads, output_dim):
    """Pure-JAX transcription of the PyTorch forward (for verification)."""
    B, x_dim = x.shape
    _, y_dim = y.shape
    hx = x_dim // num_heads
    hy = y_dim // num_heads
    out = (x @ params["w_x_weight"].T + params["w_x_bias"]
           + y @ params["w_y_weight"].T + params["w_y_bias"])
    head_x = x.reshape(B, num_heads, hx)
    head_y = y.reshape(B, num_heads, hy)
    W = params["w_xy"].reshape(num_heads, hx, -1)              # .view(H, hx, -1)
    t = jnp.matmul(head_x[:, :, None, :], W)                   # (B, H, 1, hy*O)
    t = t.reshape(B, num_heads, output_dim, hy)                # .view(-1, H, O, hy)
    xy = jnp.matmul(t, head_y[:, :, :, None])[..., 0]          # (B, H, O)
    return out + xy.sum(axis=1)


def _make_params(key, x_dim, y_dim, H, O):
    hx, hy = x_dim // H, y_dim // H
    k = jax.random.split(key, 3)
    xavier_std = math.sqrt(2.0 / (H * hx * hy + O))
    return {
        "w_x_weight": jax.random.normal(k[0], (O, x_dim), jnp.float32) / math.sqrt(x_dim),
        "w_x_bias": jnp.full((O,), 0.1, jnp.float32),
        "w_y_weight": jax.random.normal(k[1], (O, y_dim), jnp.float32) / math.sqrt(y_dim),
        "w_y_bias": jnp.full((O,), -0.05, jnp.float32),
        "w_xy": jax.random.normal(k[2], (H * hx * hy, O), jnp.float32) * xavier_std,
    }


if __name__ == "__main__":
    root = jax.random.PRNGKey(0)
    k_cfg = jax.random.split(root, 3)

    # Config 1: the common FinalMLP setting (O = 1) -> specialised kernel, f32.
    B, x_dim, y_dim, H, O = 8, 32, 16, 4, 1
    k = jax.random.split(k_cfg[0], 3)
    x = jax.random.normal(k[0], (B, x_dim), jnp.float32)
    y = jax.random.normal(k[1], (B, y_dim), jnp.float32)
    params = _make_params(k[2], x_dim, y_dim, H, O)
    out = jax.block_until_ready(
        interaction_aggregation(x, y, params, num_heads=H, output_dim=O))
    ref = reference(x, y, params, H, O)
    assert out.shape == (B, O), out.shape
    assert jnp.allclose(out, ref, atol=1e-4, rtol=1e-4), (out, ref)

    # Config 2: multi-output head (O > 1) -> general matmul-only kernel, f32,
    # two grid steps (exercises the batch pipeline + lane-padded interior).
    B2, x_dim2, y_dim2, H2, O2 = 16, 24, 24, 2, 3
    k2 = jax.random.split(k_cfg[1], 3)
    x2 = jax.random.normal(k2[0], (B2, x_dim2), jnp.float32)
    y2 = jax.random.normal(k2[1], (B2, y_dim2), jnp.float32)
    params2 = _make_params(k2[2], x_dim2, y_dim2, H2, O2)
    out2 = jax.block_until_ready(
        interaction_aggregation(x2, y2, params2, num_heads=H2, output_dim=O2))
    ref2 = reference(x2, y2, params2, H2, O2)
    assert out2.shape == (B2, O2), out2.shape
    assert jnp.allclose(out2, ref2, atol=1e-4, rtol=1e-4), (out2, ref2)

    # Config 3: O = 1 with bf16 activations + bf16 MXU weights (v6e/v7x-native
    # dtype path), multiple grid steps; f32 accumulation, bf16 output store.
    B3, x_dim3, y_dim3, H3, O3 = 64, 128, 64, 4, 1
    k3 = jax.random.split(k_cfg[2], 3)
    x3 = jax.random.normal(k3[0], (B3, x_dim3), jnp.float32).astype(jnp.bfloat16)
    y3 = jax.random.normal(k3[1], (B3, y_dim3), jnp.float32).astype(jnp.bfloat16)
    params3 = _make_params(k3[2], x_dim3, y_dim3, H3, O3)
    out3 = jax.block_until_ready(
        interaction_aggregation(x3, y3, params3, num_heads=H3, output_dim=O3,
                                mxu_dtype=jnp.bfloat16))
    ref3 = reference(x3.astype(jnp.float32), y3.astype(jnp.float32), params3, H3, O3)
    assert out3.shape == (B3, O3), out3.shape
    assert jnp.allclose(out3.astype(jnp.float32), ref3, atol=2e-2, rtol=2e-2), (out3, ref3)

    print("KERNEL_OK")
</pallas_src>

<mosaic_0001>
module attributes {stable_mosaic.version = 11 : i64} {
  func.func @_interaction_o1_kernel(%arg0: i32, %arg1: memref<8x32xf32, #tpu.memory_space<vmem>>, %arg2: memref<8x16xf32, #tpu.memory_space<vmem>>, %arg3: memref<32x16xf32, #tpu.memory_space<vmem>>, %arg4: memref<1x16xf32, #tpu.memory_space<vmem>>, %arg5: memref<32x1xf32, #tpu.memory_space<vmem>>, %arg6: memref<1x1xf32, #tpu.memory_space<vmem>>, %arg7: memref<8x1xf32, #tpu.memory_space<vmem>>) attributes {dimension_semantics = [#tpu.dimension_semantics<parallel>], iteration_bounds = array<i64: 1>, scalar_prefetch = 0 : i64, scratch_operands = 0 : i64, tpu.core_type = #tpu.core_type<tc>, window_params = [{transform_indices = @transform_0, window_bounds = array<i64: 8, 32>}, {transform_indices = @transform_1, window_bounds = array<i64: 8, 16>}, {pipeline_mode = #tpu.pipeline_mode<synchronous>, transform_indices = @transform_2, window_bounds = array<i64: 32, 16>}, {pipeline_mode = #tpu.pipeline_mode<synchronous>, transform_indices = @transform_3, window_bounds = array<i64: 1, 16>}, {pipeline_mode = #tpu.pipeline_mode<synchronous>, transform_indices = @transform_4, window_bounds = array<i64: 32, 1>}, {pipeline_mode = #tpu.pipeline_mode<synchronous>, transform_indices = @transform_5, window_bounds = array<i64: 1, 1>}, {transform_indices = @transform_6, window_bounds = array<i64: 8, 1>}]} {
    %c0 = arith.constant 0 : index
    %c0_0 = arith.constant 0 : index
    %0 = vector.load %arg1[%c0, %c0_0] : memref<8x32xf32, #tpu.memory_space<vmem>>, vector<8x32xf32>
    %c0_1 = arith.constant 0 : index
    %c0_2 = arith.constant 0 : index
    %1 = vector.load %arg3[%c0_1, %c0_2] : memref<32x16xf32, #tpu.memory_space<vmem>>, vector<32x16xf32>
    %cst = arith.constant dense<0.000000e+00> : vector<8x16xf32>
    %2 = tpu.matmul %0, %1, %cst {dimension_numbers = #tpu.dot_dimension_numbers<[1], [0], [0], [1], [0, 0, 1, 1], [], []>} : vector<8x32xf32>, vector<32x16xf32>, vector<8x16xf32> -> vector<8x16xf32>
    %c0_3 = arith.constant 0 : index
    %c0_4 = arith.constant 0 : index
    %3 = vector.load %arg4[%c0_3, %c0_4] : memref<1x16xf32, #tpu.memory_space<vmem>>, vector<1x16xf32>
    %4 = vector.broadcast %3 : vector<1x16xf32> to vector<8x16xf32>
    %5 = arith.addf %2, %4 : vector<8x16xf32>
    %c0_5 = arith.constant 0 : index
    %c0_6 = arith.constant 0 : index
    %6 = vector.load %arg2[%c0_5, %c0_6] : memref<8x16xf32, #tpu.memory_space<vmem>>, vector<8x16xf32>
    %7 = arith.mulf %5, %6 : vector<8x16xf32>
    %cst_7 = arith.constant dense<0.000000e+00> : vector<8xf32>
    %8 = vector.multi_reduction <add>, %7, %cst_7 [1] : vector<8x16xf32> to vector<8xf32>
    %9 = vector.shape_cast %8 : vector<8xf32> to vector<8x1xf32>
    %c0_8 = arith.constant 0 : index
    %c0_9 = arith.constant 0 : index
    %10 = vector.load %arg1[%c0_8, %c0_9] : memref<8x32xf32, #tpu.memory_space<vmem>>, vector<8x32xf32>
    %c0_10 = arith.constant 0 : index
    %c0_11 = arith.constant 0 : index
    %11 = vector.load %arg5[%c0_10, %c0_11] : memref<32x1xf32, #tpu.memory_space<vmem>>, vector<32x1xf32>
    %cst_12 = arith.constant dense<0.000000e+00> : vector<8x1xf32>
    %12 = tpu.matmul %10, %11, %cst_12 {dimension_numbers = #tpu.dot_dimension_numbers<[1], [0], [0], [1], [0, 0, 1, 1], [], []>} : vector<8x32xf32>, vector<32x1xf32>, vector<8x1xf32> -> vector<8x1xf32>
    %13 = arith.addf %9, %12 : vector<8x1xf32>
    %c0_13 = arith.constant 0 : index
    %c0_14 = arith.constant 0 : index
    %14 = vector.load %arg6[%c0_13, %c0_14] : memref<1x1xf32, #tpu.memory_space<vmem>>, vector<1x1xf32>
    %15 = vector.broadcast %14 : vector<1x1xf32> to vector<8x1xf32>
    %16 = arith.addf %13, %15 : vector<8x1xf32>
    %c0_15 = arith.constant 0 : index
    %c0_16 = arith.constant 0 : index
    %17 = vector.load %arg7[%c0_15, %c0_16] : memref<8x1xf32, #tpu.memory_space<vmem>>, vector<8x1xf32>
    tpu.vector_store %arg7[%c0_15, %c0_16], %16 {strides = array<i32>} : memref<8x1xf32, #tpu.memory_space<vmem>>, vector<8x1xf32>,
    return
  }
  func.func @transform_0(%arg0: i32) -> (i32, i32) {
    %c0_i32 = arith.constant 0 : i32
    %c0_i32_0 = arith.constant 0 : i32
    return %arg0, %c0_i32 : i32, i32
  }
  func.func @transform_1(%arg0: i32) -> (i32, i32) {
    %c0_i32 = arith.constant 0 : i32
    %c0_i32_0 = arith.constant 0 : i32
    return %arg0, %c0_i32 : i32, i32
  }
  func.func @transform_2(%arg0: i32) -> (i32, i32) {
    %c0_i32 = arith.constant 0 : i32
    %c0_i32_0 = arith.constant 0 : i32
    %c0_i32_1 = arith.constant 0 : i32
    return %c0_i32, %c0_i32_0 : i32, i32
  }
  func.func @transform_3(%arg0: i32) -> (i32, i32) {
    %c0_i32 = arith.constant 0 : i32
    %c0_i32_0 = arith.constant 0 : i32
    %c0_i32_1 = arith.constant 0 : i32
    return %c0_i32, %c0_i32_0 : i32, i32
  }
  func.func @transform_4(%arg0: i32) -> (i32, i32) {
    %c0_i32 = arith.constant 0 : i32
    %c0_i32_0 = arith.constant 0 : i32
    %c0_i32_1 = arith.constant 0 : i32
    return %c0_i32, %c0_i32_0 : i32, i32
  }
  func.func @transform_5(%arg0: i32) -> (i32, i32) {
    %c0_i32 = arith.constant 0 : i32
    %c0_i32_0 = arith.constant 0 : i32
    %c0_i32_1 = arith.constant 0 : i32
    return %c0_i32, %c0_i32_0 : i32, i32
  }
  func.func @transform_6(%arg0: i32) -> (i32, i32) {
    %c0_i32 = arith.constant 0 : i32
    %c0_i32_0 = arith.constant 0 : i32
    return %arg0, %c0_i32 : i32, i32
  }
}

</mosaic_0001>

<bundles_post_ra>
// kernel: interaction_aggregation.1
= control target key start
LH: loop header
LB: loop body
LE: loop exit
PB: predicated region body
PF: predicated region fallthrough
CT: control target
= control target key end

     0   :  { %vm34_vm0 = vcmask 261120   ;;  %vm60_vm1 = vcmask 130048   ;;  %vm94_vm2 = vcmask 7168   ;;  %s178_s2 = inlined_call_operand.vmem [shape: f32[32,16], index: 2, kind: input, shape index: {}]   ;;  %s179_s4 = inlined_call_operand.vmem [shape: f32[32,1], index: 4, kind: input, shape index: {}]   ;;  %s180_s0 = inlined_call_operand.vmem [shape: f32[8,32], index: 0, kind: input, shape index: {}]   ;;  %s181_s3 = inlined_call_operand.vmem [shape: f32[1,16], index: 3, kind: input, shape index: {}]   ;;  %s182_s1 = inlined_call_operand.vmem [shape: f32[8,16], index: 1, kind: input, shape index: {}]   ;;  %s183_s5 = inlined_call_operand.<no memory space> [shape: f32[1,1], index: 5, kind: input, shape index: {}]   ;;  %s184_s6 = inlined_call_operand.vmem [shape: f32[8,1], index: 6, kind: output, shape index: {}]  }
   0x1   :  { %v29_v0 = vld [vmem:[%s178_s2 + $0x18] sm:$0xff]  ;;  %v28_v1 = vld [vmem:[%s178_s2 + $0x10] sm:$0xff]  ;;  %v27_v3 = vld [vmem:[%s178_s2 + $0x8] sm:$0xff]  ;;  %v11_v15 = vstv %s183_s5 }
   0x2   :  { %50 = vmatpush.msra.mxu0 %v29_v0  ;;  %v67_v2 = vld [vmem:[%s179_s4 + $0x18] sm:$0xff]  ;;  %v66_v4 = vld [vmem:[%s179_s4 + $0x10] sm:$0xff]  ;;  %v65_v5 = vld [vmem:[%s179_s4 + $0x8] sm:$0xff]  ;;  %12 = vst [vmem:[#allocation2] sm:$0x1] %v11_v15 }
   0x3   :  { %80 = vmatpush.msra.mxu1 %v67_v2  ;;  %v26_v6 = vld [vmem:[%s178_s2] sm:$0xff] }
   0x4   :  { %51 = vmatpush.msra.mxu0 %v28_v1  ;;  %v25_v7 = vld [vmem:[%s180_s0] sm:$0xff] }
   0x5   :  { %81 = vmatpush.msra.mxu1 %v66_v4  ;;  %v64_v8 = vld [vmem:[%s179_s4] sm:$0xff] }
   0x6   :  { %52 = vmatpush.msra.mxu0 %v27_v3  ;;  %v102_v9 = vld [vmem:[%s181_s3] ss:$0 sm:$0xff] }
   0x7   :  { %82 = vmatpush.msra.mxu1 %v65_v5  ;;  %v58_v11 = vld [vmem:[%s182_s1] sm:$0xff] }
   0x8   :  { %53 = vmatpush.msra.mxu0 %v26_v6 }
   0x9   :  { %100 = vmatmul.msk.f32.vlgmr.msra.gmra.mxu0 %vm34_vm0, %v25_v7  ;;  %83 = vmatpush.msra.mxu1 %v64_v8  ;;  %v103_v17 = vld [vmem:[#allocation2] ss:$0 sm:$0xff] }
   0xa   :  { %101 = vmatmul.msk.f32.vlgmr.msra.gmra.mxu1 %vm34_vm0, %v25_v7 }
  0x86   :  { %v55_v10 = vpop.f32.mrf.mxu0 }
  0x87   :  { %v56_v12 = vadd.f32 %v102_v9, %v55_v10  ;;  %v85_v16 = vpop.f32.mrf.mxu1 }
  0x89   :  { %v59_v13 = vmul.f32 %v58_v11, %v56_v12 }
  0x8b   :  { %v61_v14 = vsel %vm60_vm1, %v59_v13, 0.0 }
  0x8c   :  { %62 = vadd.xlane.f32.xlu0 %v61_v14 }
  0xff   :  { %v63_v18 = vpop.xlane.xlu0 %62 }
 0x100   :  { %v88_v19 = vadd.f32 %v85_v16, %v63_v18 }
 0x102   :  { %v93_v20 = vadd.f32 %v103_v17, %v88_v19 }
 0x104   :  { %95 = vst.msk [vmem:[%s184_s6] sm:$0xff] %vm94_vm2, %v93_v20 }

</bundles_post_ra>
